<compile_context>
chip_gen: v5e
topology: v5e:2x2
jax: 0.10.0
libtpu: 0.0.40
codegen_flags: <defaults>
</compile_context>

<pallas_src>
import functools

import jax
import jax.numpy as jnp
from jax.experimental import pallas as pl
from jax.experimental.pallas import tpu as pltpu


def _round_up(x, m):
    return (x + m - 1) // m * m


def _pad2d(arr, shape):
    return jnp.pad(arr, [(0, s - d) for d, s in zip(arr.shape, shape)])


def _tpu_config():
    """(vmem_limit_bytes, max_tile), chosen per TPU generation at trace time."""
    try:
        phys = int(pltpu.get_tpu_info().vmem_capacity_bytes)
    except Exception:
        phys = 64 * 1024 * 1024  # conservative (v7x-sized) fallback
    if phys >= 96 * 1024 * 1024:
        # v5e / v6e: 128 MiB physical VMEM.
        return 96 * 1024 * 1024, 2048
    # v7x: 64 MiB physical VMEM.  2048x2048 bf16 A tile double-buffered plus
    # XW/acc/out is ~21 MiB, comfortably under the 48 MiB budget.
    return 48 * 1024 * 1024, 2048


# ---------------------------------------------------------------------------
# Kernel 1: dense feature transform  XW = X @ W  (row-tiled, bf16 output)
# ---------------------------------------------------------------------------
def _transform_kernel(x_ref, w_ref, o_ref):
    o_ref[...] = jnp.dot(x_ref[...], w_ref[...],
                         preferred_element_type=jnp.float32).astype(o_ref.dtype)


def dense_transform(x, w, tm, vmem_limit):
    n, k = x.shape
    f = w.shape[1]
    return pl.pallas_call(
        _transform_kernel,
        out_shape=jax.ShapeDtypeStruct((n, f), jnp.bfloat16),
        grid=(n // tm,),
        in_specs=[pl.BlockSpec((tm, k), lambda i: (i, 0)),
                  pl.BlockSpec((k, f), lambda i: (0, 0))],
        out_specs=pl.BlockSpec((tm, f), lambda i: (i, 0)),
        compiler_params=pltpu.CompilerParams(
            dimension_semantics=("parallel",),
            vmem_limit_bytes=vmem_limit),
        cost_estimate=pl.CostEstimate(
            flops=2 * n * k * f, transcendentals=0,
            bytes_accessed=(n * k + k * f + n * f) * 2),
    )(x, w)


# ---------------------------------------------------------------------------
# Kernel 2: first aggregation fused with the second feature transform
#   HW2 = relu(A_hat @ XW1 + b1) @ W2        (tiled k-reduction, W2 resident)
# ---------------------------------------------------------------------------
def _aggregate_relu_transform_kernel(a_ref, xw_ref, b1_ref, w2_ref, o_ref,
                                     acc_ref):
    k = pl.program_id(1)

    @pl.when(k == 0)
    def _():
        acc_ref[...] = jnp.zeros_like(acc_ref)

    acc_ref[...] += jnp.dot(a_ref[...], xw_ref[...],
                            preferred_element_type=jnp.float32)

    @pl.when(k == pl.num_programs(1) - 1)
    def _():
        # Bias add + ReLU in f32; dropout == identity (eval mode).
        h1 = jnp.maximum(acc_ref[...] + b1_ref[...], 0.0)
        # Fused second feature transform: rides the otherwise-idle MXU and
        # avoids writing/re-reading h1 through HBM.
        o_ref[...] = jnp.dot(h1.astype(jnp.bfloat16), w2_ref[...],
                             preferred_element_type=jnp.float32
                             ).astype(o_ref.dtype)


def aggregate_relu_transform(a, xw, b1, w2, tm, tk, vmem_limit):
    n = a.shape[0]
    hid = xw.shape[1]
    mid = w2.shape[1]
    return pl.pallas_call(
        _aggregate_relu_transform_kernel,
        out_shape=jax.ShapeDtypeStruct((n, mid), jnp.bfloat16),
        grid=(n // tm, n // tk),
        in_specs=[pl.BlockSpec((tm, tk), lambda i, k: (i, k)),
                  pl.BlockSpec((tk, hid), lambda i, k: (k, 0)),
                  pl.BlockSpec((1, hid), lambda i, k: (0, 0)),
                  pl.BlockSpec((hid, mid), lambda i, k: (0, 0))],
        out_specs=pl.BlockSpec((tm, mid), lambda i, k: (i, 0)),
        scratch_shapes=[pltpu.VMEM((tm, hid), jnp.float32)],
        compiler_params=pltpu.CompilerParams(
            dimension_semantics=("parallel", "arbitrary"),
            vmem_limit_bytes=vmem_limit),
        cost_estimate=pl.CostEstimate(
            flops=2 * n * n * hid + 2 * n * hid * mid,
            transcendentals=0,
            bytes_accessed=(n * n * 2                      # A_hat
                            + (n // tm) * n * hid * 2      # XW re-read per row tile
                            + hid * mid * 2                # W2 (resident)
                            + n * mid * 2                  # output
                            + hid * 4)),                   # bias
    )(a, xw, b1, w2)


# ---------------------------------------------------------------------------
# Kernel 3: final aggregation fused with Linear classifier + log_softmax
# ---------------------------------------------------------------------------
def _aggregate_classify_kernel(a_ref, hw_ref, b2_ref, wc_ref, bc_ref, o_ref,
                               acc_ref, *, num_classes):
    k = pl.program_id(1)

    @pl.when(k == 0)
    def _():
        acc_ref[...] = jnp.zeros_like(acc_ref)

    acc_ref[...] += jnp.dot(a_ref[...], hw_ref[...],
                            preferred_element_type=jnp.float32)

    @pl.when(k == pl.num_programs(1) - 1)
    def _():
        h2 = jnp.maximum(acc_ref[...] + b2_ref[...], 0.0)          # f32
        logits = jnp.dot(h2.astype(jnp.bfloat16), wc_ref[...],
                         preferred_element_type=jnp.float32) + bc_ref[...]
        # Mask padded class lanes so they do not perturb max / sum-exp.
        col = jax.lax.broadcasted_iota(jnp.int32, logits.shape, 1)
        logits = jnp.where(col < num_classes, logits, jnp.float32(-1e30))
        m = jnp.max(logits, axis=1, keepdims=True)
        shifted = logits - m
        lse = jnp.log(jnp.sum(jnp.exp(shifted), axis=1, keepdims=True))
        o_ref[...] = shifted - lse


def aggregate_classify(a, hw, b2, wc, bc, tm, tk, *, num_classes, vmem_limit):
    n = a.shape[0]
    f = hw.shape[1]
    c = wc.shape[1]
    kern = functools.partial(_aggregate_classify_kernel,
                             num_classes=num_classes)
    return pl.pallas_call(
        kern,
        out_shape=jax.ShapeDtypeStruct((n, c), jnp.float32),
        grid=(n // tm, n // tk),
        in_specs=[pl.BlockSpec((tm, tk), lambda i, k: (i, k)),
                  pl.BlockSpec((tk, f), lambda i, k: (k, 0)),
                  pl.BlockSpec((1, f), lambda i, k: (0, 0)),
                  pl.BlockSpec((f, c), lambda i, k: (0, 0)),
                  pl.BlockSpec((1, c), lambda i, k: (0, 0))],
        out_specs=pl.BlockSpec((tm, c), lambda i, k: (i, 0)),
        scratch_shapes=[pltpu.VMEM((tm, f), jnp.float32)],
        compiler_params=pltpu.CompilerParams(
            dimension_semantics=("parallel", "arbitrary"),
            vmem_limit_bytes=vmem_limit),
        cost_estimate=pl.CostEstimate(
            flops=2 * n * n * f + 2 * n * f * c,
            transcendentals=n * c,
            bytes_accessed=(n * n * 2                      # A_hat
                            + (n // tm) * n * f * 2        # HW re-read per row tile
                            + f * c * 2                    # Wc (resident)
                            + n * c * 4                    # output
                            + (f + c) * 4)),               # biases
    )(a, hw, b2, wc, bc)


# ---------------------------------------------------------------------------
# Glue
# ---------------------------------------------------------------------------
def build_normalized_adjacency(edge_index, num_nodes):
    """Dense D^-1/2 (A + I) D^-1/2 (PyG gcn_norm). Self-loop weight forced to 1."""
    src, dst = edge_index[0], edge_index[1]
    a = jnp.zeros((num_nodes, num_nodes), jnp.float32).at[src, dst].set(1.0)
    eye = jnp.eye(num_nodes, dtype=jnp.float32)
    a = a * (1.0 - eye) + eye          # guard against pre-existing self-loops
    deg = jnp.sum(a, axis=1)
    d_inv_sqrt = jnp.where(deg > 0, jax.lax.rsqrt(deg), 0.0)
    return d_inv_sqrt[:, None] * a * d_inv_sqrt[None, :]


def gcn_forward(x, a_hat, params, *, tile=None):
    """log_softmax((relu(A relu(A X W1 + b1) W2 + b2)) Wc + bc) over classes."""
    n, in_dim = x.shape
    hid = params["w1"].shape[1]
    mid = params["w2"].shape[1]
    out = params["wc"].shape[1]

    vmem_limit, max_tile = _tpu_config()
    if tile is None:
        tile = max_tile

    # Pad node and feature dims to multiples of 128 (lane-dense tiles / MXU).
    n128 = _round_up(n, 128)
    tm = min(tile, n128)
    # Keep >= 2 row tiles when the graph is big enough so the "parallel" grid
    # axis can feed both TensorCores on v7x megacore.
    if tm == n128 and n128 >= 256:
        tm = max(128, (n128 // 2) // 128 * 128)
    tk = tm
    n_pad = _round_up(n, tm)
    in_p, hid_p, mid_p, out_p = (_round_up(d, 128) for d in (in_dim, hid, mid, out))

    a_p = _pad2d(a_hat, (n_pad, n_pad)).astype(jnp.bfloat16)
    x_p = _pad2d(x, (n_pad, in_p)).astype(jnp.bfloat16)
    w1_p = _pad2d(params["w1"], (in_p, hid_p)).astype(jnp.bfloat16)
    b1_p = _pad2d(params["b1"], (1, hid_p)).astype(jnp.float32)
    w2_p = _pad2d(params["w2"], (hid_p, mid_p)).astype(jnp.bfloat16)
    b2_p = _pad2d(params["b2"], (1, mid_p)).astype(jnp.float32)
    wc_p = _pad2d(params["wc"], (mid_p, out_p)).astype(jnp.bfloat16)
    bc_p = _pad2d(params["bc"], (1, out_p)).astype(jnp.float32)

    # The pure row-tiled transform has no k axis -> can amortize per-step
    # overhead with an even larger row tile (still dividing n_pad).
    tm_dense = tm
    while tm_dense * 2 <= min(n_pad, 2048) and n_pad % (tm_dense * 2) == 0:
        tm_dense *= 2

    xw1 = dense_transform(x_p, w1_p, tm_dense, vmem_limit)     # [n_pad, hid_p] bf16
    hw2 = aggregate_relu_transform(a_p, xw1, b1_p, w2_p,       # [n_pad, mid_p] bf16
                                   tm, tk, vmem_limit)
    logp = aggregate_classify(a_p, hw2, b2_p, wc_p, bc_p, tm, tk,
                              num_classes=out, vmem_limit=vmem_limit)
    return logp[:n, :out]


def init_params(key, in_dim, hid_dim, mid_dim, out_dim):
    ks = jax.random.split(key, 6)

    def glorot(k, fan_in, fan_out):
        lim = jnp.sqrt(6.0 / (fan_in + fan_out))
        return jax.random.uniform(k, (fan_in, fan_out), jnp.float32, -lim, lim)

    return {
        "w1": glorot(ks[0], in_dim, hid_dim),
        "b1": jax.random.normal(ks[1], (1, hid_dim), jnp.float32) * 0.01,
        "w2": glorot(ks[2], hid_dim, mid_dim),
        "b2": jax.random.normal(ks[3], (1, mid_dim), jnp.float32) * 0.01,
        "wc": glorot(ks[4], mid_dim, out_dim),
        "bc": jax.random.normal(ks[5], (1, out_dim), jnp.float32) * 0.01,
    }


def reference_forward(x, edge_index, params):
    a_hat = build_normalized_adjacency(edge_index, x.shape[0])
    h = jnp.maximum(a_hat @ (x @ params["w1"]) + params["b1"], 0.0)
    h = jnp.maximum(a_hat @ (h @ params["w2"]) + params["b2"], 0.0)
    logits = h @ params["wc"] + params["bc"]
    return jax.nn.log_softmax(logits, axis=1)


if __name__ == "__main__":
    key = jax.random.PRNGKey(0)
    k_x, k_p = jax.random.split(key)

    # Small synthetic graph: 16 nodes, undirected ring (both directions).
    num_nodes, in_dim, hid_dim, mid_dim, out_dim = 16, 8, 32, 16, 4
    src = jnp.arange(num_nodes, dtype=jnp.int32)
    dst = (src + 1) % num_nodes
    edge_index = jnp.stack(
        [jnp.concatenate([src, dst]), jnp.concatenate([dst, src])], axis=0)

    x = jax.random.normal(k_x, (num_nodes, in_dim), jnp.float32)
    params = init_params(k_p, in_dim, hid_dim, mid_dim, out_dim)

    # Build the normalized adjacency ONCE and reuse it across forward calls.
    a_hat = build_normalized_adjacency(edge_index, num_nodes)

    forward = jax.jit(gcn_forward)
    out = jax.block_until_ready(forward(x, a_hat, params))

    ref = reference_forward(x, edge_index, params)
    assert out.shape == (num_nodes, out_dim)
    # bf16 MXU operands vs. all-f32 reference -> modest tolerance.
    max_err = float(jnp.max(jnp.abs(out - ref)))
    assert jnp.allclose(out, ref, atol=1e-1, rtol=1e-1), max_err

    print("KERNEL_OK")
</pallas_src>

<mosaic_0001>
module attributes {stable_mosaic.version = 11 : i64} {
  func.func @_transform_kernel(%arg0: i32, %arg1: memref<128x128xbf16, #tpu.memory_space<vmem>>, %arg2: memref<128x128xbf16, #tpu.memory_space<vmem>>, %arg3: memref<128x128xbf16, #tpu.memory_space<vmem>>) attributes {dimension_semantics = [#tpu.dimension_semantics<parallel>], iteration_bounds = array<i64: 1>, scalar_prefetch = 0 : i64, scratch_operands = 0 : i64, tpu.core_type = #tpu.core_type<tc>, window_params = [{transform_indices = @transform_0, window_bounds = array<i64: 128, 128>}, {pipeline_mode = #tpu.pipeline_mode<synchronous>, transform_indices = @transform_1, window_bounds = array<i64: 128, 128>}, {transform_indices = @transform_2, window_bounds = array<i64: 128, 128>}]} {
    %c0 = arith.constant 0 : index
    %c0_0 = arith.constant 0 : index
    %0 = vector.load %arg1[%c0, %c0_0] : memref<128x128xbf16, #tpu.memory_space<vmem>>, vector<128x128xbf16>
    %c0_1 = arith.constant 0 : index
    %c0_2 = arith.constant 0 : index
    %1 = vector.load %arg2[%c0_1, %c0_2] : memref<128x128xbf16, #tpu.memory_space<vmem>>, vector<128x128xbf16>
    %cst = arith.constant dense<0.000000e+00> : vector<128x128xf32>
    %2 = tpu.matmul %0, %1, %cst {dimension_numbers = #tpu.dot_dimension_numbers<[1], [0], [0], [1], [0, 0, 1, 1], [], []>} : vector<128x128xbf16>, vector<128x128xbf16>, vector<128x128xf32> -> vector<128x128xf32>
    %3 = arith.truncf %2 : vector<128x128xf32> to vector<128x128xbf16>
    %c0_3 = arith.constant 0 : index
    %c0_4 = arith.constant 0 : index
    %4 = vector.load %arg3[%c0_3, %c0_4] : memref<128x128xbf16, #tpu.memory_space<vmem>>, vector<128x128xbf16>
    tpu.vector_store %arg3[%c0_3, %c0_4], %3 {strides = array<i32>} : memref<128x128xbf16, #tpu.memory_space<vmem>>, vector<128x128xbf16>,
    return
  }
  func.func @transform_0(%arg0: i32) -> (i32, i32) {
    %c0_i32 = arith.constant 0 : i32
    %c0_i32_0 = arith.constant 0 : i32
    return %arg0, %c0_i32 : i32, i32
  }
  func.func @transform_1(%arg0: i32) -> (i32, i32) {
    %c0_i32 = arith.constant 0 : i32
    %c0_i32_0 = arith.constant 0 : i32
    %c0_i32_1 = arith.constant 0 : i32
    return %c0_i32, %c0_i32_0 : i32, i32
  }
  func.func @transform_2(%arg0: i32) -> (i32, i32) {
    %c0_i32 = arith.constant 0 : i32
    %c0_i32_0 = arith.constant 0 : i32
    return %arg0, %c0_i32 : i32, i32
  }
}

module attributes {stable_mosaic.version = 11 : i64} {
  func.func @_aggregate_relu_transform_kernel(%arg0: i32, %arg1: i32, %arg2: memref<128x128xbf16, #tpu.memory_space<vmem>>, %arg3: memref<128x128xbf16, #tpu.memory_space<vmem>>, %arg4: memref<1x128xf32, #tpu.memory_space<vmem>>, %arg5: memref<128x128xbf16, #tpu.memory_space<vmem>>, %arg6: memref<128x128xbf16, #tpu.memory_space<vmem>>, %arg7: memref<128x128xf32, #tpu.memory_space<vmem>>) attributes {dimension_semantics = [#tpu.dimension_semantics<parallel>, #tpu.dimension_semantics<arbitrary>], iteration_bounds = array<i64: 1, 1>, scalar_prefetch = 0 : i64, scratch_operands = 1 : i64, tpu.core_type = #tpu.core_type<tc>, window_params = [{transform_indices = @transform_0, window_bounds = array<i64: 128, 128>}, {transform_indices = @transform_1, window_bounds = array<i64: 128, 128>}, {pipeline_mode = #tpu.pipeline_mode<synchronous>, transform_indices = @transform_2, window_bounds = array<i64: 1, 128>}, {pipeline_mode = #tpu.pipeline_mode<synchronous>, transform_indices = @transform_3, window_bounds = array<i64: 128, 128>}, {transform_indices = @transform_4, window_bounds = array<i64: 128, 128>}]} {
    %c0_i32 = arith.constant 0 : i32
    %0 = arith.cmpi eq, %arg1, %c0_i32 : i32
    %1 = arith.extui %0 : i1 to i32
    %c0_i32_0 = arith.constant 0 : i32
    %2 = arith.cmpi ne, %1, %c0_i32_0 : i32
    scf.if %2 {
      %cst_10 = arith.constant 0.000000e+00 : f32
      %12 = vector.broadcast %cst_10 : f32 to vector<128x128xf32>
      %c0_11 = arith.constant 0 : index
      %c0_12 = arith.constant 0 : index
      %13 = vector.load %arg7[%c0_11, %c0_12] : memref<128x128xf32, #tpu.memory_space<vmem>>, vector<128x128xf32>
      tpu.vector_store %arg7[%c0_11, %c0_12], %12 {strides = array<i32>} : memref<128x128xf32, #tpu.memory_space<vmem>>, vector<128x128xf32>,
    } else {
    }
    %c0 = arith.constant 0 : index
    %c0_1 = arith.constant 0 : index
    %3 = vector.load %arg7[%c0, %c0_1] : memref<128x128xf32, #tpu.memory_space<vmem>>, vector<128x128xf32>
    %c0_2 = arith.constant 0 : index
    %c0_3 = arith.constant 0 : index
    %4 = vector.load %arg2[%c0_2, %c0_3] : memref<128x128xbf16, #tpu.memory_space<vmem>>, vector<128x128xbf16>
    %c0_4 = arith.constant 0 : index
    %c0_5 = arith.constant 0 : index
    %5 = vector.load %arg3[%c0_4, %c0_5] : memref<128x128xbf16, #tpu.memory_space<vmem>>, vector<128x128xbf16>
    %cst = arith.constant dense<0.000000e+00> : vector<128x128xf32>
    %6 = tpu.matmul %4, %5, %cst {dimension_numbers = #tpu.dot_dimension_numbers<[1], [0], [0], [1], [0, 0, 1, 1], [], []>} : vector<128x128xbf16>, vector<128x128xbf16>, vector<128x128xf32> -> vector<128x128xf32>
    %7 = arith.addf %3, %6 : vector<128x128xf32>
    %c0_6 = arith.constant 0 : index
    %c0_7 = arith.constant 0 : index
    %8 = vector.load %arg7[%c0_6, %c0_7] : memref<128x128xf32, #tpu.memory_space<vmem>>, vector<128x128xf32>
    tpu.vector_store %arg7[%c0_6, %c0_7], %7 {strides = array<i32>} : memref<128x128xf32, #tpu.memory_space<vmem>>, vector<128x128xf32>,
    %c0_i32_8 = arith.constant 0 : i32
    %9 = arith.cmpi eq, %arg1, %c0_i32_8 : i32
    %10 = arith.extui %9 : i1 to i32
    %c0_i32_9 = arith.constant 0 : i32
    %11 = arith.cmpi ne, %10, %c0_i32_9 : i32
    scf.if %11 {
      %c0_10 = arith.constant 0 : index
      %c0_11 = arith.constant 0 : index
      %12 = vector.load %arg7[%c0_10, %c0_11] : memref<128x128xf32, #tpu.memory_space<vmem>>, vector<128x128xf32>
      %c0_12 = arith.constant 0 : index
      %c0_13 = arith.constant 0 : index
      %13 = vector.load %arg4[%c0_12, %c0_13] : memref<1x128xf32, #tpu.memory_space<vmem>>, vector<1x128xf32>
      %14 = vector.broadcast %13 : vector<1x128xf32> to vector<128x128xf32>
      %15 = arith.addf %12, %14 : vector<128x128xf32>
      %cst_14 = arith.constant 0.000000e+00 : f32
      %16 = vector.broadcast %cst_14 : f32 to vector<128x128xf32>
      %17 = arith.maximumf %15, %16 : vector<128x128xf32>
      %18 = arith.truncf %17 : vector<128x128xf32> to vector<128x128xbf16>
      %c0_15 = arith.constant 0 : index
      %c0_16 = arith.constant 0 : index
      %19 = vector.load %arg5[%c0_15, %c0_16] : memref<128x128xbf16, #tpu.memory_space<vmem>>, vector<128x128xbf16>
      %cst_17 = arith.constant dense<0.000000e+00> : vector<128x128xf32>
      %20 = tpu.matmul %18, %19, %cst_17 {dimension_numbers = #tpu.dot_dimension_numbers<[1], [0], [0], [1], [0, 0, 1, 1], [], []>} : vector<128x128xbf16>, vector<128x128xbf16>, vector<128x128xf32> -> vector<128x128xf32>
      %21 = arith.truncf %20 : vector<128x128xf32> to vector<128x128xbf16>
      %c0_18 = arith.constant 0 : index
      %c0_19 = arith.constant 0 : index
      %22 = vector.load %arg6[%c0_18, %c0_19] : memref<128x128xbf16, #tpu.memory_space<vmem>>, vector<128x128xbf16>
      tpu.vector_store %arg6[%c0_18, %c0_19], %21 {strides = array<i32>} : memref<128x128xbf16, #tpu.memory_space<vmem>>, vector<128x128xbf16>,
    } else {
    }
    return
  }
  func.func @transform_0(%arg0: i32, %arg1: i32) -> (i32, i32) {
    %c0_i32 = arith.constant 0 : i32
    return %arg0, %arg1 : i32, i32
  }
  func.func @transform_1(%arg0: i32, %arg1: i32) -> (i32, i32) {
    %c0_i32 = arith.constant 0 : i32
    %c0_i32_0 = arith.constant 0 : i32
    return %arg1, %c0_i32 : i32, i32
  }
  func.func @transform_2(%arg0: i32, %arg1: i32) -> (i32, i32) {
    %c0_i32 = arith.constant 0 : i32
    %c0_i32_0 = arith.constant 0 : i32
    %c0_i32_1 = arith.constant 0 : i32
    return %c0_i32, %c0_i32_0 : i32, i32
  }
  func.func @transform_3(%arg0: i32, %arg1: i32) -> (i32, i32) {
    %c0_i32 = arith.constant 0 : i32
    %c0_i32_0 = arith.constant 0 : i32
    %c0_i32_1 = arith.constant 0 : i32
    return %c0_i32, %c0_i32_0 : i32, i32
  }
  func.func @transform_4(%arg0: i32, %arg1: i32) -> (i32, i32) {
    %c0_i32 = arith.constant 0 : i32
    %c0_i32_0 = arith.constant 0 : i32
    return %arg0, %c0_i32 : i32, i32
  }
}

module attributes {stable_mosaic.version = 11 : i64} {
  func.func @_aggregate_classify_kernel(%arg0: i32, %arg1: i32, %arg2: memref<128x128xbf16, #tpu.memory_space<vmem>>, %arg3: memref<128x128xbf16, #tpu.memory_space<vmem>>, %arg4: memref<1x128xf32, #tpu.memory_space<vmem>>, %arg5: memref<128x128xbf16, #tpu.memory_space<vmem>>, %arg6: memref<1x128xf32, #tpu.memory_space<vmem>>, %arg7: memref<128x128xf32, #tpu.memory_space<vmem>>, %arg8: memref<128x128xf32, #tpu.memory_space<vmem>>) attributes {dimension_semantics = [#tpu.dimension_semantics<parallel>, #tpu.dimension_semantics<arbitrary>], iteration_bounds = array<i64: 1, 1>, scalar_prefetch = 0 : i64, scratch_operands = 1 : i64, tpu.core_type = #tpu.core_type<tc>, window_params = [{transform_indices = @transform_0, window_bounds = array<i64: 128, 128>}, {transform_indices = @transform_1, window_bounds = array<i64: 128, 128>}, {pipeline_mode = #tpu.pipeline_mode<synchronous>, transform_indices = @transform_2, window_bounds = array<i64: 1, 128>}, {pipeline_mode = #tpu.pipeline_mode<synchronous>, transform_indices = @transform_3, window_bounds = array<i64: 128, 128>}, {pipeline_mode = #tpu.pipeline_mode<synchronous>, transform_indices = @transform_4, window_bounds = array<i64: 1, 128>}, {transform_indices = @transform_5, window_bounds = array<i64: 128, 128>}]} {
    %c0_i32 = arith.constant 0 : i32
    %0 = arith.cmpi eq, %arg1, %c0_i32 : i32
    %1 = arith.extui %0 : i1 to i32
    %c0_i32_0 = arith.constant 0 : i32
    %2 = arith.cmpi ne, %1, %c0_i32_0 : i32
    scf.if %2 {
      %cst_10 = arith.constant 0.000000e+00 : f32
      %12 = vector.broadcast %cst_10 : f32 to vector<128x128xf32>
      %c0_11 = arith.constant 0 : index
      %c0_12 = arith.constant 0 : index
      %13 = vector.load %arg8[%c0_11, %c0_12] : memref<128x128xf32, #tpu.memory_space<vmem>>, vector<128x128xf32>
      tpu.vector_store %arg8[%c0_11, %c0_12], %12 {strides = array<i32>} : memref<128x128xf32, #tpu.memory_space<vmem>>, vector<128x128xf32>,
    } else {
    }
    %c0 = arith.constant 0 : index
    %c0_1 = arith.constant 0 : index
    %3 = vector.load %arg8[%c0, %c0_1] : memref<128x128xf32, #tpu.memory_space<vmem>>, vector<128x128xf32>
    %c0_2 = arith.constant 0 : index
    %c0_3 = arith.constant 0 : index
    %4 = vector.load %arg2[%c0_2, %c0_3] : memref<128x128xbf16, #tpu.memory_space<vmem>>, vector<128x128xbf16>
    %c0_4 = arith.constant 0 : index
    %c0_5 = arith.constant 0 : index
    %5 = vector.load %arg3[%c0_4, %c0_5] : memref<128x128xbf16, #tpu.memory_space<vmem>>, vector<128x128xbf16>
    %cst = arith.constant dense<0.000000e+00> : vector<128x128xf32>
    %6 = tpu.matmul %4, %5, %cst {dimension_numbers = #tpu.dot_dimension_numbers<[1], [0], [0], [1], [0, 0, 1, 1], [], []>} : vector<128x128xbf16>, vector<128x128xbf16>, vector<128x128xf32> -> vector<128x128xf32>
    %7 = arith.addf %3, %6 : vector<128x128xf32>
    %c0_6 = arith.constant 0 : index
    %c0_7 = arith.constant 0 : index
    %8 = vector.load %arg8[%c0_6, %c0_7] : memref<128x128xf32, #tpu.memory_space<vmem>>, vector<128x128xf32>
    tpu.vector_store %arg8[%c0_6, %c0_7], %7 {strides = array<i32>} : memref<128x128xf32, #tpu.memory_space<vmem>>, vector<128x128xf32>,
    %c0_i32_8 = arith.constant 0 : i32
    %9 = arith.cmpi eq, %arg1, %c0_i32_8 : i32
    %10 = arith.extui %9 : i1 to i32
    %c0_i32_9 = arith.constant 0 : i32
    %11 = arith.cmpi ne, %10, %c0_i32_9 : i32
    scf.if %11 {
      %c0_10 = arith.constant 0 : index
      %c0_11 = arith.constant 0 : index
      %12 = vector.load %arg8[%c0_10, %c0_11] : memref<128x128xf32, #tpu.memory_space<vmem>>, vector<128x128xf32>
      %c0_12 = arith.constant 0 : index
      %c0_13 = arith.constant 0 : index
      %13 = vector.load %arg4[%c0_12, %c0_13] : memref<1x128xf32, #tpu.memory_space<vmem>>, vector<1x128xf32>
      %14 = vector.broadcast %13 : vector<1x128xf32> to vector<128x128xf32>
      %15 = arith.addf %12, %14 : vector<128x128xf32>
      %cst_14 = arith.constant 0.000000e+00 : f32
      %16 = vector.broadcast %cst_14 : f32 to vector<128x128xf32>
      %17 = arith.maximumf %15, %16 : vector<128x128xf32>
      %18 = arith.truncf %17 : vector<128x128xf32> to vector<128x128xbf16>
      %c0_15 = arith.constant 0 : index
      %c0_16 = arith.constant 0 : index
      %19 = vector.load %arg5[%c0_15, %c0_16] : memref<128x128xbf16, #tpu.memory_space<vmem>>, vector<128x128xbf16>
      %cst_17 = arith.constant dense<0.000000e+00> : vector<128x128xf32>
      %20 = tpu.matmul %18, %19, %cst_17 {dimension_numbers = #tpu.dot_dimension_numbers<[1], [0], [0], [1], [0, 0, 1, 1], [], []>} : vector<128x128xbf16>, vector<128x128xbf16>, vector<128x128xf32> -> vector<128x128xf32>
      %c0_18 = arith.constant 0 : index
      %c0_19 = arith.constant 0 : index
      %21 = vector.load %arg6[%c0_18, %c0_19] : memref<1x128xf32, #tpu.memory_space<vmem>>, vector<1x128xf32>
      %22 = vector.broadcast %21 : vector<1x128xf32> to vector<128x128xf32>
      %23 = arith.addf %20, %22 : vector<128x128xf32>
      %24 = tpu.iota {dimensions = array<i32: 1>} : vector<128x128xi32>
      %c4_i32 = arith.constant 4 : i32
      %25 = vector.broadcast %c4_i32 : i32 to vector<128x128xi32>
      %26 = arith.cmpi slt, %24, %25 : vector<128x128xi32>
      %cst_20 = arith.constant -1.000000e+30 : f32
      %27 = vector.broadcast %cst_20 : f32 to vector<128x128xf32>
      %28 = arith.select %26, %23, %27 : vector<128x128xi1>, vector<128x128xf32>
      %cst_21 = arith.constant dense<0xFF800000> : vector<128xf32>
      %29 = vector.multi_reduction <maximumf>, %28, %cst_21 [1] : vector<128x128xf32> to vector<128xf32>
      %30 = vector.shape_cast %29 : vector<128xf32> to vector<128x1xf32>
      %31 = vector.broadcast %30 : vector<128x1xf32> to vector<128x128xf32>
      %32 = arith.subf %28, %31 : vector<128x128xf32>
      %33 = math.exp %32 : vector<128x128xf32>
      %cst_22 = arith.constant dense<0.000000e+00> : vector<128xf32>
      %34 = vector.multi_reduction <add>, %33, %cst_22 [1] : vector<128x128xf32> to vector<128xf32>
      %35 = vector.shape_cast %34 : vector<128xf32> to vector<128x1xf32>
      %36 = math.log %35 : vector<128x1xf32>
      %37 = vector.broadcast %36 : vector<128x1xf32> to vector<128x128xf32>
      %38 = arith.subf %32, %37 : vector<128x128xf32>
      %c0_23 = arith.constant 0 : index
      %c0_24 = arith.constant 0 : index
      %39 = vector.load %arg7[%c0_23, %c0_24] : memref<128x128xf32, #tpu.memory_space<vmem>>, vector<128x128xf32>
      tpu.vector_store %arg7[%c0_23, %c0_24], %38 {strides = array<i32>} : memref<128x128xf32, #tpu.memory_space<vmem>>, vector<128x128xf32>,
    } else {
    }
    return
  }
  func.func @transform_0(%arg0: i32, %arg1: i32) -> (i32, i32) {
    %c0_i32 = arith.constant 0 : i32
    return %arg0, %arg1 : i32, i32
  }
  func.func @transform_1(%arg0: i32, %arg1: i32) -> (i32, i32) {
    %c0_i32 = arith.constant 0 : i32
    %c0_i32_0 = arith.constant 0 : i32
    return %arg1, %c0_i32 : i32, i32
  }
  func.func @transform_2(%arg0: i32, %arg1: i32) -> (i32, i32) {
    %c0_i32 = arith.constant 0 : i32
    %c0_i32_0 = arith.constant 0 : i32
    %c0_i32_1 = arith.constant 0 : i32
    return %c0_i32, %c0_i32_0 : i32, i32
  }
  func.func @transform_3(%arg0: i32, %arg1: i32) -> (i32, i32) {
    %c0_i32 = arith.constant 0 : i32
    %c0_i32_0 = arith.constant 0 : i32
    %c0_i32_1 = arith.constant 0 : i32
    return %c0_i32, %c0_i32_0 : i32, i32
  }
  func.func @transform_4(%arg0: i32, %arg1: i32) -> (i32, i32) {
    %c0_i32 = arith.constant 0 : i32
    %c0_i32_0 = arith.constant 0 : i32
    %c0_i32_1 = arith.constant 0 : i32
    return %c0_i32, %c0_i32_0 : i32, i32
  }
  func.func @transform_5(%arg0: i32, %arg1: i32) -> (i32, i32) {
    %c0_i32 = arith.constant 0 : i32
    %c0_i32_0 = arith.constant 0 : i32
    return %arg0, %c0_i32 : i32, i32
  }
}

</mosaic_0001>

<bundles_post_ra>
// kernel: gcn_forward.3
= control target key start
LH: loop header
LB: loop body
LE: loop exit
PB: predicated region body
PF: predicated region fallthrough
CT: control target
= control target key end

     0   :  { %s462_s1 = inlined_call_operand.vmem [shape: bf16[128,128], index: 1, kind: input, shape index: {}]   ;;  %s463_s0 = inlined_call_operand.vmem [shape: bf16[128,128], index: 0, kind: input, shape index: {}]   ;;  %s464_s2 = inlined_call_operand.vmem [shape: bf16[128,128], index: 2, kind: output, shape index: {}]  }
   0x1   :  { %v303_v0 = vld [vmem:[%s462_s1 + $0x38] sm:$0xff]  ;;  %v302_v1 = vld [vmem:[%s462_s1 + $0x30] sm:$0xff]  ;;  %v301_v2 = vld [vmem:[%s462_s1 + $0x28] sm:$0xff] }
   0x2   :  { %139 = vmatpush.bf16.msra.mxu0 %v303_v0  ;;  %351 = vmatpush.bf16.msra.mxu1 %v303_v0  ;;  %v300_v3 = vld [vmem:[%s462_s1 + $0x20] sm:$0xff]  ;;  %v299_v4 = vld [vmem:[%s462_s1 + $0x18] sm:$0xff]  ;;  %v298_v5 = vld [vmem:[%s462_s1 + $0x10] sm:$0xff] }
   0x3   :  { %352 = vmatpush.bf16.msra.mxu2 %v303_v0  ;;  %353 = vmatpush.bf16.msra.mxu3 %v303_v0  ;;  %v297_v6 = vld [vmem:[%s462_s1 + $0x8] sm:$0xff]  ;;  %v296_v7 = vld [vmem:[%s462_s1] sm:$0xff]  ;;  %v290_v9 = vld [vmem:[%s463_s0 + $0x10] sm:$0xff] }
   0x4   :  { %v288_v8 = vld [vmem:[%s463_s0] sm:$0xff]  ;;  %v294_v11 = vld [vmem:[%s463_s0 + $0x30] sm:$0xff]  ;;  %v289_v12 = vld [vmem:[%s463_s0 + $0x8] sm:$0xff] }
   0x5   :  { %v292_v10 = vld [vmem:[%s463_s0 + $0x20] sm:$0xff]  ;;  %v291_v13 = vld [vmem:[%s463_s0 + $0x18] sm:$0xff]  ;;  %v293_v14 = vld [vmem:[%s463_s0 + $0x28] sm:$0xff] }
   0x6   :  { %140 = vmatpush.bf16.msra.mxu0 %v302_v1  ;;  %354 = vmatpush.bf16.msra.mxu1 %v302_v1  ;;  %v295_v15 = vld [vmem:[%s463_s0 + $0x38] sm:$0xff] }
   0x7   :  { %355 = vmatpush.bf16.msra.mxu2 %v302_v1  ;;  %356 = vmatpush.bf16.msra.mxu3 %v302_v1 }
   0xa   :  { %141 = vmatpush.bf16.msra.mxu0 %v301_v2  ;;  %357 = vmatpush.bf16.msra.mxu1 %v301_v2 }
   0xb   :  { %358 = vmatpush.bf16.msra.mxu2 %v301_v2  ;;  %359 = vmatpush.bf16.msra.mxu3 %v301_v2 }
   0xe   :  { %142 = vmatpush.bf16.msra.mxu0 %v300_v3  ;;  %360 = vmatpush.bf16.msra.mxu1 %v300_v3 }
   0xf   :  { %361 = vmatpush.bf16.msra.mxu2 %v300_v3  ;;  %362 = vmatpush.bf16.msra.mxu3 %v300_v3 }
  0x12   :  { %143 = vmatpush.bf16.msra.mxu0 %v299_v4  ;;  %363 = vmatpush.bf16.msra.mxu1 %v299_v4 }
  0x13   :  { %364 = vmatpush.bf16.msra.mxu2 %v299_v4  ;;  %365 = vmatpush.bf16.msra.mxu3 %v299_v4 }
  0x16   :  { %144 = vmatpush.bf16.msra.mxu0 %v298_v5  ;;  %366 = vmatpush.bf16.msra.mxu1 %v298_v5 }
  0x17   :  { %367 = vmatpush.bf16.msra.mxu2 %v298_v5  ;;  %368 = vmatpush.bf16.msra.mxu3 %v298_v5 }
  0x1a   :  { %145 = vmatpush.bf16.msra.mxu0 %v297_v6  ;;  %369 = vmatpush.bf16.msra.mxu1 %v297_v6 }
  0x1b   :  { %370 = vmatpush.bf16.msra.mxu2 %v297_v6  ;;  %371 = vmatpush.bf16.msra.mxu3 %v297_v6 }
  0x1e   :  { %146 = vmatpush.bf16.msra.mxu0 %v296_v7  ;;  %372 = vmatpush.bf16.msra.mxu1 %v296_v7 }
  0x1f   :  { %373 = vmatpush.bf16.msra.mxu2 %v296_v7  ;;  %374 = vmatpush.bf16.msra.mxu3 %v296_v7 }
  0x21   :  { %147 = vmatmul.bf16.vlgmr.msra.gmra.mxu0 %v288_v8  ;;  %157 = vmatmul.bf16.vlgmr.msra.gmra.mxu1 %v290_v9 }
  0x22   :  { %167 = vmatmul.bf16.vlgmr.msra.gmra.mxu2 %v292_v10  ;;  %177 = vmatmul.bf16.vlgmr.msra.gmra.mxu3 %v294_v11 }
  0x31   :  { %152 = vmatmul.bf16.gmra.mxu0 %v289_v12  ;;  %162 = vmatmul.bf16.gmra.mxu1 %v291_v13 }
  0x32   :  { %172 = vmatmul.bf16.gmra.mxu2 %v293_v14  ;;  %182 = vmatmul.bf16.gmra.mxu3 %v295_v15 }
  0x9e   :  { %v148_v16 = vpop.f32.mrf.mxu0  ;;  %v158_v17 = vpop.f32.mrf.mxu1 }
  0xa5   :  { %v168_v18 = vpop.f32.mrf.mxu2  ;;  %v178_v19 = vpop.f32.mrf.mxu3 }
  0xa6   :  { %v150_v20 = vpop.f32.mrf.mxu0  ;;  %v160_v21 = vpop.f32.mrf.mxu1 }
  0xa7   :  { %v307_v22 = vpack.c.bf16 %v150_v20, %v148_v16  ;;  %v317_v23 = vpack.c.bf16 %v160_v21, %v158_v17 }
  0xa9   :  { %308 = vst [vmem:[%s464_s2] sm:$0xff] %v307_v22  }
  0xaa   :  { %345 = vst [vmem:[%s464_s2 + $0x10] sm:$0xff] %v317_v23  }
  0xad   :  { %v170_v24 = vpop.f32.mrf.mxu2  ;;  %v180_v25 = vpop.f32.mrf.mxu3 }
  0xae   :  { %v327_v26 = vpack.c.bf16 %v170_v24, %v168_v18  ;;  %v337_v27 = vpack.c.bf16 %v180_v25, %v178_v19  ;;  %v153_v28 = vpop.f32.mrf.mxu0  ;;  %v163_v29 = vpop.f32.mrf.mxu1 }
  0xb0   :  { %347 = vst [vmem:[%s464_s2 + $0x20] sm:$0xff] %v327_v26  }
  0xb1   :  { %349 = vst [vmem:[%s464_s2 + $0x30] sm:$0xff] %v337_v27  }
  0xb5   :  { %v173_v30 = vpop.f32.mrf.mxu2  ;;  %v183_v31 = vpop.f32.mrf.mxu3 }
  0xb6   :  { %v155_v32 = vpop.f32.mrf.mxu0  ;;  %v165_v33 = vpop.f32.mrf.mxu1 }
  0xb7   :  { %v312_v34 = vpack.c.bf16 %v155_v32, %v153_v28  ;;  %v322_v35 = vpack.c.bf16 %v165_v33, %v163_v29 }
  0xb9   :  { %344 = vst [vmem:[%s464_s2 + $0x8] sm:$0xff] %v312_v34  }
  0xba   :  { %346 = vst [vmem:[%s464_s2 + $0x18] sm:$0xff] %v322_v35  }
  0xbd   :  { %v175_v36 = vpop.f32.mrf.mxu2  ;;  %v185_v37 = vpop.f32.mrf.mxu3 }
  0xbe   :  { %v332_v38 = vpack.c.bf16 %v175_v36, %v173_v30  ;;  %v342_v39 = vpack.c.bf16 %v185_v37, %v183_v31 }
  0xc0   :  { %348 = vst [vmem:[%s464_s2 + $0x28] sm:$0xff] %v332_v38  }
  0xc1   :  { %350 = vst [vmem:[%s464_s2 + $0x38] sm:$0xff] %v342_v39  }

// kernel: gcn_forward.4
= control target key start
LH: loop header
LB: loop body
LE: loop exit
PB: predicated region body
PF: predicated region fallthrough
CT: control target
= control target key end

     0   :  { %s782_s1 = inlined_call_operand.vmem [shape: bf16[128,128], index: 1, kind: input, shape index: {}]   ;;  %s783_s2 = inlined_call_operand.vmem [shape: f32[1,128], index: 2, kind: input, shape index: {}]   ;;  %s784_s0 = inlined_call_operand.vmem [shape: bf16[128,128], index: 0, kind: input, shape index: {}]   ;;  %s785_s3 = inlined_call_operand.vmem [shape: bf16[128,128], index: 3, kind: input, shape index: {}]   ;;  %s786_s4 = inlined_call_operand.vmem [shape: bf16[128,128], index: 4, kind: output, shape index: {}]  }
   0x1   :  { %v585_v0 = vld [vmem:[%s782_s1 + $0x38] sm:$0xff]  ;;  %v584_v1 = vld [vmem:[%s782_s1 + $0x30] sm:$0xff]  ;;  %v583_v2 = vld [vmem:[%s782_s1 + $0x28] sm:$0xff] }
   0x2   :  { %181 = vmatpush.bf16.msra.mxu0 %v585_v0  ;;  %641 = vmatpush.bf16.msra.mxu2 %v585_v0  ;;  %v582_v3 = vld [vmem:[%s782_s1 + $0x20] sm:$0xff]  ;;  %v581_v4 = vld [vmem:[%s782_s1 + $0x18] sm:$0xff]  ;;  %v580_v5 = vld [vmem:[%s782_s1 + $0x10] sm:$0xff] }
   0x3   :  { %v579_v6 = vld [vmem:[%s782_s1 + $0x8] sm:$0xff]  ;;  %v578_v7 = vld [vmem:[%s782_s1] sm:$0xff]  ;;  %v593_v12 = vld [vmem:[%s785_s3 + $0x38] sm:$0xff] }
   0x4   :  { %v570_v8 = vld [vmem:[%s784_s0] sm:$0xff]  ;;  %v571_v10 = vld [vmem:[%s784_s0 + $0x8] sm:$0xff]  ;;  %389 = vmatpush.bf16.msra.mxu1 %v593_v12  ;;  %v592_v13 = vld [vmem:[%s785_s3 + $0x30] sm:$0xff]  ;;  %649 = vmatpush.bf16.msra.mxu3 %v593_v12 }
   0x5   :  { %v574_v9 = vld [vmem:[%s784_s0 + $0x20] sm:$0xff]  ;;  %v575_v11 = vld [vmem:[%s784_s0 + $0x28] sm:$0xff]  ;;  %v572_v16 = vld [vmem:[%s784_s0 + $0x10] sm:$0xff] }
   0x6   :  { %182 = vmatpush.bf16.msra.mxu0 %v584_v1  ;;  %642 = vmatpush.bf16.msra.mxu2 %v584_v1  ;;  %v591_v14 = vld [vmem:[%s785_s3 + $0x28] sm:$0xff]  ;;  %v590_v15 = vld [vmem:[%s785_s3 + $0x20] sm:$0xff]  ;;  %v576_v17 = vld [vmem:[%s784_s0 + $0x30] sm:$0xff] }
   0x7   :  { %v573_v18 = vld [vmem:[%s784_s0 + $0x18] sm:$0xff]  ;;  %v588_v21 = vld [vmem:[%s785_s3 + $0x10] sm:$0xff]  ;;  %v587_v22 = vld [vmem:[%s785_s3 + $0x8] sm:$0xff] }
   0x8   :  { %390 = vmatpush.bf16.msra.mxu1 %v592_v13  ;;  %650 = vmatpush.bf16.msra.mxu3 %v592_v13  ;;  %v577_v19 = vld [vmem:[%s784_s0 + $0x38] sm:$0xff]  ;;  %v586_v23 = vld [vmem:[%s785_s3] sm:$0xff] }
   0x9   :  { %v589_v20 = vld [vmem:[%s785_s3 + $0x18] sm:$0xff]  ;;  %v657_v25 = vld [vmem:[%s783_s2] ss:$0 sm:$0xff] }
   0xa   :  { %183 = vmatpush.bf16.msra.mxu0 %v583_v2  ;;  %643 = vmatpush.bf16.msra.mxu2 %v583_v2 }
   0xc   :  { %391 = vmatpush.bf16.msra.mxu1 %v591_v14  ;;  %651 = vmatpush.bf16.msra.mxu3 %v591_v14 }
   0xe   :  { %184 = vmatpush.bf16.msra.mxu0 %v582_v3  ;;  %644 = vmatpush.bf16.msra.mxu2 %v582_v3 }
  0x10   :  { %392 = vmatpush.bf16.msra.mxu1 %v590_v15  ;;  %652 = vmatpush.bf16.msra.mxu3 %v590_v15 }
  0x12   :  { %185 = vmatpush.bf16.msra.mxu0 %v581_v4  ;;  %645 = vmatpush.bf16.msra.mxu2 %v581_v4 }
  0x14   :  { %393 = vmatpush.bf16.msra.mxu1 %v589_v20  ;;  %653 = vmatpush.bf16.msra.mxu3 %v589_v20 }
  0x16   :  { %186 = vmatpush.bf16.msra.mxu0 %v580_v5  ;;  %646 = vmatpush.bf16.msra.mxu2 %v580_v5 }
  0x18   :  { %394 = vmatpush.bf16.msra.mxu1 %v588_v21  ;;  %654 = vmatpush.bf16.msra.mxu3 %v588_v21 }
  0x1a   :  { %187 = vmatpush.bf16.msra.mxu0 %v579_v6  ;;  %647 = vmatpush.bf16.msra.mxu2 %v579_v6 }
  0x1c   :  { %395 = vmatpush.bf16.msra.mxu1 %v587_v22  ;;  %655 = vmatpush.bf16.msra.mxu3 %v587_v22 }
  0x1e   :  { %188 = vmatpush.bf16.msra.mxu0 %v578_v7  ;;  %648 = vmatpush.bf16.msra.mxu2 %v578_v7 }
  0x20   :  { %396 = vmatpush.bf16.msra.mxu1 %v586_v23  ;;  %656 = vmatpush.bf16.msra.mxu3 %v586_v23 }
  0x21   :  { %189 = vmatmul.bf16.vlgmr.msra.gmra.mxu0 %v570_v8  ;;  %209 = vmatmul.bf16.vlgmr.msra.gmra.mxu2 %v574_v9 }
  0x31   :  { %194 = vmatmul.bf16.gmra.mxu0 %v571_v10  ;;  %214 = vmatmul.bf16.gmra.mxu2 %v575_v11 }
  0x41   :  { %199 = vmatmul.bf16.gmra.mxu0 %v572_v16  ;;  %219 = vmatmul.bf16.gmra.mxu2 %v576_v17 }
  0x51   :  { %204 = vmatmul.bf16.gmra.mxu0 %v573_v18  ;;  %224 = vmatmul.bf16.gmra.mxu2 %v577_v19 }
  0x9e   :  { %v190_v24 = vpop.f32.mrf.mxu0 }
  0x9f   :  { %v285_v26 = vadd.f32 %v657_v25, %v190_v24 }
  0xa1   :  { %v301_v29 = vmax.f32 %v285_v26, 0.0 }
  0xa4   :  { %v210_v27 = vpop.f32.mrf.mxu2 }
  0xa5   :  { %v293_v32 = vadd.f32 %v657_v25, %v210_v27 }
  0xa6   :  { %v192_v28 = vpop.f32.mrf.mxu0 }
  0xa7   :  { %v286_v30 = vadd.f32 %v657_v25, %v192_v28  ;;  %v309_v37 = vmax.f32 %v293_v32, 0.0 }
  0xa9   :  { %v302_v31 = vmax.f32 %v286_v30, 0.0 }
  0xab   :  { %v317_v33 = vpack.c.bf16 %v302_v31, %v301_v29 }
  0xac   :  { %v212_v34 = vpop.f32.mrf.mxu2 }
  0xad   :  { %v294_v35 = vadd.f32 %v657_v25, %v212_v34  ;;  %397 = vmatmul.bf16.vlgmr.msra.gmra.mxu1 %v317_v33 }
  0xae   :  { %v195_v36 = vpop.f32.mrf.mxu0 }
  0xaf   :  { %v310_v38 = vmax.f32 %v294_v35, 0.0  ;;  %v287_v40 = vadd.f32 %v657_v25, %v195_v36 }
  0xb1   :  { %v321_v39 = vpack.c.bf16 %v310_v38, %v309_v37  ;;  %v303_v43 = vmax.f32 %v287_v40, 0.0 }
  0xb3   :  { %417 = vmatmul.bf16.vlgmr.msra.gmra.mxu3 %v321_v39 }
  0xb4   :  { %v215_v41 = vpop.f32.mrf.mxu2 }
  0xb5   :  { %v295_v46 = vadd.f32 %v657_v25, %v215_v41 }
  0xb6   :  { %v197_v42 = vpop.f32.mrf.mxu0 }
  0xb7   :  { %v288_v44 = vadd.f32 %v657_v25, %v197_v42  ;;  %v311_v51 = vmax.f32 %v295_v46, 0.0 }
  0xb9   :  { %v304_v45 = vmax.f32 %v288_v44, 0.0 }
  0xbb   :  { %v318_v47 = vpack.c.bf16 %v304_v45, %v303_v43 }
  0xbc   :  { %v217_v48 = vpop.f32.mrf.mxu2 }
  0xbd   :  { %v296_v49 = vadd.f32 %v657_v25, %v217_v48  ;;  %402 = vmatmul.bf16.gmra.mxu1 %v318_v47 }
  0xbe   :  { %v200_v50 = vpop.f32.mrf.mxu0 }
  0xbf   :  { %v312_v52 = vmax.f32 %v296_v49, 0.0  ;;  %v289_v54 = vadd.f32 %v657_v25, %v200_v50 }
  0xc1   :  { %v322_v53 = vpack.c.bf16 %v312_v52, %v311_v51  ;;  %v305_v57 = vmax.f32 %v289_v54, 0.0 }
  0xc3   :  { %422 = vmatmul.bf16.gmra.mxu3 %v322_v53 }
  0xc4   :  { %v220_v55 = vpop.f32.mrf.mxu2 }
  0xc5   :  { %v297_v60 = vadd.f32 %v657_v25, %v220_v55 }
  0xc6   :  { %v202_v56 = vpop.f32.mrf.mxu0 }
  0xc7   :  { %v290_v58 = vadd.f32 %v657_v25, %v202_v56  ;;  %v313_v1 = vmax.f32 %v297_v60, 0.0 }
  0xc9   :  { %v306_v59 = vmax.f32 %v290_v58, 0.0 }
  0xcb   :  { %v319_v61 = vpack.c.bf16 %v306_v59, %v305_v57 }
  0xcc   :  { %v222_v62 = vpop.f32.mrf.mxu2 }
  0xcd   :  { %v298_v63 = vadd.f32 %v657_v25, %v222_v62  ;;  %407 = vmatmul.bf16.gmra.mxu1 %v319_v61 }
  0xce   :  { %v205_v0 = vpop.f32.mrf.mxu0 }
  0xcf   :  { %v314_v2 = vmax.f32 %v298_v63, 0.0  ;;  %v291_v4 = vadd.f32 %v657_v25, %v205_v0 }
  0xd1   :  { %v323_v3 = vpack.c.bf16 %v314_v2, %v313_v1  ;;  %v307_v7 = vmax.f32 %v291_v4, 0.0 }
  0xd3   :  { %427 = vmatmul.bf16.gmra.mxu3 %v323_v3 }
  0xd4   :  { %v225_v5 = vpop.f32.mrf.mxu2 }
  0xd5   :  { %v299_v10 = vadd.f32 %v657_v25, %v225_v5 }
  0xd6   :  { %v207_v6 = vpop.f32.mrf.mxu0 }
  0xd7   :  { %v292_v8 = vadd.f32 %v657_v25, %v207_v6  ;;  %v315_v14 = vmax.f32 %v299_v10, 0.0 }
  0xd9   :  { %v308_v9 = vmax.f32 %v292_v8, 0.0 }
  0xdb   :  { %v320_v11 = vpack.c.bf16 %v308_v9, %v307_v7 }
  0xdc   :  { %v227_v12 = vpop.f32.mrf.mxu2 }
  0xdd   :  { %v300_v13 = vadd.f32 %v657_v25, %v227_v12  ;;  %412 = vmatmul.bf16.gmra.mxu1 %v320_v11 }
  0xdf   :  { %v316_v15 = vmax.f32 %v300_v13, 0.0 }
  0xe1   :  { %v324_v16 = vpack.c.bf16 %v316_v15, %v315_v14 }
  0xe3   :  { %432 = vmatmul.bf16.gmra.mxu3 %v324_v16 }
 0x12a   :  { %v398_v17 = vpop.f32.mrf.mxu1 }
 0x132   :  { %v400_v18 = vpop.f32.mrf.mxu1 }
 0x133   :  { %v597_v19 = vpack.c.bf16 %v400_v18, %v398_v17 }
 0x135   :  { %598 = vst [vmem:[%s786_s4] sm:$0xff] %v597_v19  }
 0x136   :  { %v418_v20 = vpop.f32.mrf.mxu3 }
 0x13a   :  { %v403_v21 = vpop.f32.mrf.mxu1 }
 0x13e   :  { %v420_v22 = vpop.f32.mrf.mxu3 }
 0x13f   :  { %v617_v23 = vpack.c.bf16 %v420_v22, %v418_v20 }
 0x141   :  { %637 = vst [vmem:[%s786_s4 + $0x20] sm:$0xff] %v617_v23  }
 0x142   :  { %v405_v24 = vpop.f32.mrf.mxu1 }
 0x143   :  { %v602_v25 = vpack.c.bf16 %v405_v24, %v403_v21 }
 0x145   :  { %634 = vst [vmem:[%s786_s4 + $0x8] sm:$0xff] %v602_v25  }
 0x146   :  { %v423_v26 = vpop.f32.mrf.mxu3 }
 0x14a   :  { %v408_v27 = vpop.f32.mrf.mxu1 }
 0x14e   :  { %v425_v28 = vpop.f32.mrf.mxu3 }
 0x14f   :  { %v622_v29 = vpack.c.bf16 %v425_v28, %v423_v26 }
 0x151   :  { %638 = vst [vmem:[%s786_s4 + $0x28] sm:$0xff] %v622_v29  }
 0x152   :  { %v410_v30 = vpop.f32.mrf.mxu1 }
 0x153   :  { %v607_v31 = vpack.c.bf16 %v410_v30, %v408_v27 }
 0x155   :  { %635 = vst [vmem:[%s786_s4 + $0x10] sm:$0xff] %v607_v31  }
 0x156   :  { %v428_v32 = vpop.f32.mrf.mxu3 }
 0x15a   :  { %v413_v33 = vpop.f32.mrf.mxu1 }
 0x15e   :  { %v430_v34 = vpop.f32.mrf.mxu3 }
 0x15f   :  { %v627_v35 = vpack.c.bf16 %v430_v34, %v428_v32 }
 0x161   :  { %639 = vst [vmem:[%s786_s4 + $0x30] sm:$0xff] %v627_v35  }
 0x162   :  { %v415_v36 = vpop.f32.mrf.mxu1 }
 0x163   :  { %v612_v37 = vpack.c.bf16 %v415_v36, %v413_v33 }
 0x165   :  { %636 = vst [vmem:[%s786_s4 + $0x18] sm:$0xff] %v612_v37  }
 0x166   :  { %v433_v38 = vpop.f32.mrf.mxu3 }
 0x16e   :  { %v435_v39 = vpop.f32.mrf.mxu3 }
 0x16f   :  { %v632_v40 = vpack.c.bf16 %v435_v39, %v433_v38 }
 0x171   :  { %640 = vst [vmem:[%s786_s4 + $0x38] sm:$0xff] %v632_v40  }

// kernel: gcn_forward.5
= control target key start
LH: loop header
LB: loop body
LE: loop exit
PB: predicated region body
PF: predicated region fallthrough
CT: control target
= control target key end

     0   :  { %s1183_s1 = inlined_call_operand.vmem [shape: bf16[128,128], index: 1, kind: input, shape index: {}]   ;;  %s1184_s2 = inlined_call_operand.vmem [shape: f32[1,128], index: 2, kind: input, shape index: {}]   ;;  %s1185_s0 = inlined_call_operand.vmem [shape: bf16[128,128], index: 0, kind: input, shape index: {}]   ;;  %s1186_s3 = inlined_call_operand.vmem [shape: bf16[128,128], index: 3, kind: input, shape index: {}]   ;;  %s1187_s4 = inlined_call_operand.vmem [shape: f32[1,128], index: 4, kind: input, shape index: {}]   ;;  %s1188_s5 = inlined_call_operand.vmem [shape: f32[128,128], index: 5, kind: output, shape index: {}]  }
   0x1   :  { %v755_v0 = vld [vmem:[%s1183_s1 + $0x38] sm:$0xff]  ;;  %v754_v1 = vld [vmem:[%s1183_s1 + $0x30] sm:$0xff]  ;;  %v753_v2 = vld [vmem:[%s1183_s1 + $0x28] sm:$0xff] }
   0x2   :  { %184 = vmatpush.bf16.msra.mxu0 %v755_v0  ;;  %764 = vmatpush.bf16.msra.mxu2 %v755_v0  ;;  %v752_v3 = vld [vmem:[%s1183_s1 + $0x20] sm:$0xff]  ;;  %v751_v4 = vld [vmem:[%s1183_s1 + $0x18] sm:$0xff]  ;;  %v750_v5 = vld [vmem:[%s1183_s1 + $0x10] sm:$0xff] }
   0x3   :  { %v749_v6 = vld [vmem:[%s1183_s1 + $0x8] sm:$0xff]  ;;  %v748_v7 = vld [vmem:[%s1183_s1] sm:$0xff]  ;;  %v763_v12 = vld [vmem:[%s1186_s3 + $0x38] sm:$0xff] }
   0x4   :  { %v740_v8 = vld [vmem:[%s1185_s0] sm:$0xff]  ;;  %v741_v10 = vld [vmem:[%s1185_s0 + $0x8] sm:$0xff]  ;;  %396 = vmatpush.bf16.msra.mxu1 %v763_v12  ;;  %v762_v13 = vld [vmem:[%s1186_s3 + $0x30] sm:$0xff]  ;;  %772 = vmatpush.bf16.msra.mxu3 %v763_v12 }
   0x5   :  { %v744_v9 = vld [vmem:[%s1185_s0 + $0x20] sm:$0xff]  ;;  %v745_v11 = vld [vmem:[%s1185_s0 + $0x28] sm:$0xff]  ;;  %v742_v16 = vld [vmem:[%s1185_s0 + $0x10] sm:$0xff] }
   0x6   :  { %185 = vmatpush.bf16.msra.mxu0 %v754_v1  ;;  %765 = vmatpush.bf16.msra.mxu2 %v754_v1  ;;  %v761_v14 = vld [vmem:[%s1186_s3 + $0x28] sm:$0xff]  ;;  %v760_v15 = vld [vmem:[%s1186_s3 + $0x20] sm:$0xff]  ;;  %v746_v17 = vld [vmem:[%s1185_s0 + $0x30] sm:$0xff] }
   0x7   :  { %v743_v18 = vld [vmem:[%s1185_s0 + $0x18] sm:$0xff]  ;;  %v758_v21 = vld [vmem:[%s1186_s3 + $0x10] sm:$0xff]  ;;  %v757_v22 = vld [vmem:[%s1186_s3 + $0x8] sm:$0xff] }
   0x8   :  { %397 = vmatpush.bf16.msra.mxu1 %v762_v13  ;;  %773 = vmatpush.bf16.msra.mxu3 %v762_v13  ;;  %v747_v19 = vld [vmem:[%s1185_s0 + $0x38] sm:$0xff]  ;;  %v756_v23 = vld [vmem:[%s1186_s3] sm:$0xff] }
   0x9   :  { %v759_v20 = vld [vmem:[%s1186_s3 + $0x18] sm:$0xff]  ;;  %v780_v25 = vld [vmem:[%s1184_s2] ss:$0 sm:$0xff] }
   0xa   :  { %186 = vmatpush.bf16.msra.mxu0 %v753_v2  ;;  %766 = vmatpush.bf16.msra.mxu2 %v753_v2 }
   0xc   :  { %398 = vmatpush.bf16.msra.mxu1 %v761_v14  ;;  %774 = vmatpush.bf16.msra.mxu3 %v761_v14 }
   0xe   :  { %187 = vmatpush.bf16.msra.mxu0 %v752_v3  ;;  %767 = vmatpush.bf16.msra.mxu2 %v752_v3 }
  0x10   :  { %399 = vmatpush.bf16.msra.mxu1 %v760_v15  ;;  %775 = vmatpush.bf16.msra.mxu3 %v760_v15 }
  0x12   :  { %188 = vmatpush.bf16.msra.mxu0 %v751_v4  ;;  %768 = vmatpush.bf16.msra.mxu2 %v751_v4 }
  0x14   :  { %400 = vmatpush.bf16.msra.mxu1 %v759_v20  ;;  %776 = vmatpush.bf16.msra.mxu3 %v759_v20 }
  0x16   :  { %189 = vmatpush.bf16.msra.mxu0 %v750_v5  ;;  %769 = vmatpush.bf16.msra.mxu2 %v750_v5 }
  0x18   :  { %401 = vmatpush.bf16.msra.mxu1 %v758_v21  ;;  %777 = vmatpush.bf16.msra.mxu3 %v758_v21 }
  0x1a   :  { %190 = vmatpush.bf16.msra.mxu0 %v749_v6  ;;  %770 = vmatpush.bf16.msra.mxu2 %v749_v6 }
  0x1c   :  { %402 = vmatpush.bf16.msra.mxu1 %v757_v22  ;;  %778 = vmatpush.bf16.msra.mxu3 %v757_v22 }
  0x1e   :  { %191 = vmatpush.bf16.msra.mxu0 %v748_v7  ;;  %771 = vmatpush.bf16.msra.mxu2 %v748_v7 }
  0x20   :  { %403 = vmatpush.bf16.msra.mxu1 %v756_v23  ;;  %779 = vmatpush.bf16.msra.mxu3 %v756_v23 }
  0x21   :  { %192 = vmatmul.bf16.vlgmr.msra.gmra.mxu0 %v740_v8  ;;  %212 = vmatmul.bf16.vlgmr.msra.gmra.mxu2 %v744_v9 }
  0x31   :  { %197 = vmatmul.bf16.gmra.mxu0 %v741_v10  ;;  %217 = vmatmul.bf16.gmra.mxu2 %v745_v11 }
  0x41   :  { %202 = vmatmul.bf16.gmra.mxu0 %v742_v16  ;;  %222 = vmatmul.bf16.gmra.mxu2 %v746_v17  ;;  %v445_v17 = vlaneseq }
  0x51   :  { %207 = vmatmul.bf16.gmra.mxu0 %v743_v18  ;;  %227 = vmatmul.bf16.gmra.mxu2 %v747_v19  ;;  %v951_v18 = vand.u32 127, %v445_v17  ;;  %v956_v19 = vld [vmem:[%s1187_s4] ss:$0 sm:$0xff] }
  0x53   :  { %vm447_vm0 = vcmp.lt.s32.totalorder %v951_v18, 4 }
  0x9e   :  { %v193_v24 = vpop.f32.mrf.mxu0 }
  0x9f   :  { %v288_v27 = vadd.f32 %v780_v25, %v193_v24 }
  0xa1   :  { %v304_v30 = vmax.f32 %v288_v27, 0.0 }
  0xa4   :  { %v213_v26 = vpop.f32.mrf.mxu2 }
  0xa5   :  { %v296_v32 = vadd.f32 %v780_v25, %v213_v26 }
  0xa6   :  { %v195_v28 = vpop.f32.mrf.mxu0 }
  0xa7   :  { %v289_v29 = vadd.f32 %v780_v25, %v195_v28  ;;  %v312_v37 = vmax.f32 %v296_v32, 0.0 }
  0xa9   :  { %v305_v31 = vmax.f32 %v289_v29, 0.0 }
  0xab   :  { %v320_v33 = vpack.c.bf16 %v305_v31, %v304_v30 }
  0xac   :  { %v215_v34 = vpop.f32.mrf.mxu2 }
  0xad   :  { %v297_v35 = vadd.f32 %v780_v25, %v215_v34  ;;  %404 = vmatmul.bf16.vlgmr.msra.gmra.mxu1 %v320_v33 }
  0xae   :  { %v198_v36 = vpop.f32.mrf.mxu0 }
  0xaf   :  { %v313_v38 = vmax.f32 %v297_v35, 0.0  ;;  %v290_v41 = vadd.f32 %v780_v25, %v198_v36 }
  0xb1   :  { %v324_v39 = vpack.c.bf16 %v313_v38, %v312_v37  ;;  %v306_v44 = vmax.f32 %v290_v41, 0.0 }
  0xb3   :  { %424 = vmatmul.bf16.vlgmr.msra.gmra.mxu3 %v324_v39 }
  0xb4   :  { %v218_v40 = vpop.f32.mrf.mxu2 }
  0xb5   :  { %v298_v46 = vadd.f32 %v780_v25, %v218_v40 }
  0xb6   :  { %v200_v42 = vpop.f32.mrf.mxu0 }
  0xb7   :  { %v291_v43 = vadd.f32 %v780_v25, %v200_v42  ;;  %v314_v51 = vmax.f32 %v298_v46, 0.0 }
  0xb9   :  { %v307_v45 = vmax.f32 %v291_v43, 0.0 }
  0xbb   :  { %v321_v47 = vpack.c.bf16 %v307_v45, %v306_v44 }
  0xbc   :  { %v220_v48 = vpop.f32.mrf.mxu2 }
  0xbd   :  { %v299_v49 = vadd.f32 %v780_v25, %v220_v48  ;;  %409 = vmatmul.bf16.gmra.mxu1 %v321_v47 }
  0xbe   :  { %v203_v50 = vpop.f32.mrf.mxu0 }
  0xbf   :  { %v315_v52 = vmax.f32 %v299_v49, 0.0  ;;  %v292_v55 = vadd.f32 %v780_v25, %v203_v50 }
  0xc1   :  { %v325_v53 = vpack.c.bf16 %v315_v52, %v314_v51  ;;  %v308_v58 = vmax.f32 %v292_v55, 0.0 }
  0xc3   :  { %429 = vmatmul.bf16.gmra.mxu3 %v325_v53 }
  0xc4   :  { %v223_v54 = vpop.f32.mrf.mxu2 }
  0xc5   :  { %v300_v60 = vadd.f32 %v780_v25, %v223_v54 }
  0xc6   :  { %v205_v56 = vpop.f32.mrf.mxu0 }
  0xc7   :  { %v293_v57 = vadd.f32 %v780_v25, %v205_v56  ;;  %v316_v1 = vmax.f32 %v300_v60, 0.0 }
  0xc9   :  { %v309_v59 = vmax.f32 %v293_v57, 0.0 }
  0xcb   :  { %v322_v61 = vpack.c.bf16 %v309_v59, %v308_v58 }
  0xcc   :  { %v225_v62 = vpop.f32.mrf.mxu2 }
  0xcd   :  { %v301_v63 = vadd.f32 %v780_v25, %v225_v62  ;;  %414 = vmatmul.bf16.gmra.mxu1 %v322_v61 }
  0xce   :  { %v208_v0 = vpop.f32.mrf.mxu0 }
  0xcf   :  { %v317_v2 = vmax.f32 %v301_v63, 0.0  ;;  %v294_v5 = vadd.f32 %v780_v25, %v208_v0 }
  0xd1   :  { %v326_v3 = vpack.c.bf16 %v317_v2, %v316_v1  ;;  %v310_v8 = vmax.f32 %v294_v5, 0.0 }
  0xd3   :  { %434 = vmatmul.bf16.gmra.mxu3 %v326_v3 }
  0xd4   :  { %v228_v4 = vpop.f32.mrf.mxu2 }
  0xd5   :  { %v302_v10 = vadd.f32 %v780_v25, %v228_v4 }
  0xd6   :  { %v210_v6 = vpop.f32.mrf.mxu0 }
  0xd7   :  { %v295_v7 = vadd.f32 %v780_v25, %v210_v6  ;;  %v318_v14 = vmax.f32 %v302_v10, 0.0 }
  0xd9   :  { %v311_v9 = vmax.f32 %v295_v7, 0.0 }
  0xdb   :  { %v323_v11 = vpack.c.bf16 %v311_v9, %v310_v8 }
  0xdc   :  { %v230_v12 = vpop.f32.mrf.mxu2 }
  0xdd   :  { %v303_v13 = vadd.f32 %v780_v25, %v230_v12  ;;  %419 = vmatmul.bf16.gmra.mxu1 %v323_v11 }
  0xdf   :  { %v319_v15 = vmax.f32 %v303_v13, 0.0 }
  0xe1   :  { %v327_v16 = vpack.c.bf16 %v319_v15, %v318_v14 }
  0xe3   :  { %439 = vmatmul.bf16.gmra.mxu3 %v327_v16 }
 0x12a   :  { %v405_v20 = vpop.f32.mrf.mxu1 }
 0x12b   :  { %v406_v21 = vadd.f32 %v956_v19, %v405_v20 }
 0x12d   :  { %v962_v22 = vsel %vm447_vm0, %v406_v21, -1e+30 }
 0x12e   :  { %464 = vmax.xlane.f32.xlu0 %v962_v22 }
 0x132   :  { %v407_v23 = vpop.f32.mrf.mxu1 }
 0x133   :  { %v408_v24 = vadd.f32 %v956_v19, %v407_v23 }
 0x135   :  { %v968_v25 = vsel %vm447_vm0, %v408_v24, -1e+30 }
 0x136   :  { %v425_v26 = vpop.f32.mrf.mxu3  ;;  %466 = vmax.xlane.f32.xlu0 %v968_v25 }
 0x137   :  { %v426_v27 = vadd.f32 %v956_v19, %v425_v26 }
 0x139   :  { %v974_v28 = vsel %vm447_vm0, %v426_v27, -1e+30 }
 0x13a   :  { %480 = vmax.xlane.f32.xlu2 %v974_v28  ;;  %v410_v29 = vpop.f32.mrf.mxu1 }
 0x13b   :  { %v411_v30 = vadd.f32 %v956_v19, %v410_v29 }
 0x13d   :  { %v980_v31 = vsel %vm447_vm0, %v411_v30, -1e+30 }
 0x13e   :  { %v427_v32 = vpop.f32.mrf.mxu3  ;;  %468 = vmax.xlane.f32.xlu1 %v980_v31 }
 0x13f   :  { %v428_v33 = vadd.f32 %v956_v19, %v427_v32 }
 0x141   :  { %v986_v34 = vsel %vm447_vm0, %v428_v33, -1e+30 }
 0x142   :  { %482 = vmax.xlane.f32.xlu0 %v986_v34  ;;  %v412_v35 = vpop.f32.mrf.mxu1 }
 0x143   :  { %v413_v36 = vadd.f32 %v956_v19, %v412_v35 }
 0x145   :  { %v992_v37 = vsel %vm447_vm0, %v413_v36, -1e+30 }
 0x146   :  { %v430_v38 = vpop.f32.mrf.mxu3  ;;  %470 = vmax.xlane.f32.xlu1 %v992_v37 }
 0x147   :  { %v431_v39 = vadd.f32 %v956_v19, %v430_v38 }
 0x149   :  { %v999_v42 = vsel %vm447_vm0, %v431_v39, -1e+30 }
 0x14a   :  { %v415_v40 = vpop.f32.mrf.mxu1 }
 0x14b   :  { %v416_v41 = vadd.f32 %v956_v19, %v415_v40 }
 0x14d   :  { %v1003_v43 = vsel %vm447_vm0, %v416_v41, -1e+30 }
 0x14e   :  { %v432_v44 = vpop.f32.mrf.mxu3  ;;  %484 = vmax.xlane.f32.xlu1 %v999_v42  ;;  %472 = vmax.xlane.f32.xlu2 %v1003_v43 }
 0x14f   :  { %v433_v45 = vadd.f32 %v956_v19, %v432_v44 }
 0x151   :  { %v1010_v47 = vsel %vm447_vm0, %v433_v45, -1e+30 }
 0x152   :  { %v417_v46 = vpop.f32.mrf.mxu1 }
 0x153   :  { %v418_v50 = vadd.f32 %v956_v19, %v417_v46 }
 0x155   :  { %v1023_v54 = vsel %vm447_vm0, %v418_v50, -1e+30 }
 0x156   :  { %v435_v48 = vpop.f32.mrf.mxu3  ;;  %486 = vmax.xlane.f32.xlu2 %v1010_v47 }
 0x157   :  { %v436_v49 = vadd.f32 %v956_v19, %v435_v48 }
 0x159   :  { %v1017_v51 = vsel %vm447_vm0, %v436_v49, -1e+30 }
 0x15a   :  { %488 = vmax.xlane.f32.xlu0 %v1017_v51  ;;  %v420_v52 = vpop.f32.mrf.mxu1 }
 0x15b   :  { %v421_v53 = vadd.f32 %v956_v19, %v420_v52 }
 0x15d   :  { %v1028_v56 = vsel %vm447_vm0, %v421_v53, -1e+30 }
 0x15e   :  { %v437_v55 = vpop.f32.mrf.mxu3  ;;  %474 = vmax.xlane.f32.xlu2 %v1023_v54 }
 0x15f   :  { %v438_v62 = vadd.f32 %v956_v19, %v437_v55 }
 0x161   :  { %v1046_v0 = vsel %vm447_vm0, %v438_v62, -1e+30 }
 0x162   :  { %v422_v57 = vpop.f32.mrf.mxu1  ;;  %476 = vmax.xlane.f32.xlu0 %v1028_v56 }
 0x163   :  { %v423_v58 = vadd.f32 %v956_v19, %v422_v57 }
 0x165   :  { %v1034_v59 = vsel %vm447_vm0, %v423_v58, -1e+30 }
 0x166   :  { %v440_v60 = vpop.f32.mrf.mxu3  ;;  %478 = vmax.xlane.f32.xlu1 %v1034_v59 }
 0x167   :  { %v441_v61 = vadd.f32 %v956_v19, %v440_v60 }
 0x169   :  { %v1041_v63 = vsel %vm447_vm0, %v441_v61, -1e+30 }
 0x16a   :  { %492 = vmax.xlane.f32.xlu2 %v1041_v63 }
 0x16e   :  { %v442_v1 = vpop.f32.mrf.mxu3  ;;  %490 = vmax.xlane.f32.xlu1 %v1046_v0 }
 0x16f   :  { %v443_v2 = vadd.f32 %v956_v19, %v442_v1 }
 0x171   :  { %v1052_v3 = vsel %vm447_vm0, %v443_v2, -1e+30 }
 0x172   :  { %494 = vmax.xlane.f32.xlu0 %v1052_v3 }
 0x1a1   :  { %v465_v4 = vpop.xlane.xlu0 %464 }
 0x1a2   :  { %v1056_v5 = vsub.f32 %v962_v22, %v465_v4 }
 0x1a4   :  { %v512_v6 = vmul.f32 1.442695, %v1056_v5 }
 0x1a6   :  { %782 = vpow2.f32 %v512_v6 }
 0x1a9   :  { %v467_v7 = vpop.xlane.xlu0 %466 }
 0x1aa   :  { %v1060_v8 = vsub.f32 %v968_v25, %v467_v7 }
 0x1ac   :  { %v783_v9 = vpop.eup %782  ;;  %v514_v10 = vmul.f32 1.442695, %v1060_v8 }
 0x1ad   :  { %v481_v11 = vpop.xlane.xlu2 %480  ;;  %544 = vadd.xlane.f32.xlu1 %v783_v9 }
 0x1ae   :  { %784 = vpow2.f32 %v514_v10  ;;  %v1064_v12 = vsub.f32 %v974_v28, %v481_v11 }
 0x1b0   :  { %v528_v13 = vmul.f32 1.442695, %v1064_v12 }
 0x1b1   :  { %v469_v14 = vpop.xlane.xlu1 %468 }
 0x1b2   :  { %786 = vpow2.f32 %v528_v13  ;;  %v1068_v15 = vsub.f32 %v980_v31, %v469_v14 }
 0x1b4   :  { %v785_v16 = vpop.eup %784  ;;  %v516_v17 = vmul.f32 1.442695, %v1068_v15 }
 0x1b5   :  { %v483_v18 = vpop.xlane.xlu0 %482  ;;  %546 = vadd.xlane.f32.xlu2 %v785_v16 }
 0x1b6   :  { %v1072_v19 = vsub.f32 %v986_v34, %v483_v18  ;;  %788 = vpow2.f32 %v516_v17 }
 0x1b8   :  { %v787_v20 = vpop.eup %786  ;;  %v530_v21 = vmul.f32 1.442695, %v1072_v19 }
 0x1b9   :  { %v471_v22 = vpop.xlane.xlu1 %470  ;;  %560 = vadd.xlane.f32.xlu0 %v787_v20 }
 0x1ba   :  { %790 = vpow2.f32 %v530_v21  ;;  %v1076_v23 = vsub.f32 %v992_v37, %v471_v22 }
 0x1bc   :  { %v518_v24 = vmul.f32 1.442695, %v1076_v23  ;;  %v789_v25 = vpop.eup %788 }
 0x1be   :  { %792 = vpow2.f32 %v518_v24 }
 0x1c0   :  { %v791_v26 = vpop.eup %790 }
 0x1c1   :  { %v485_v27 = vpop.xlane.xlu1 %484  ;;  %v473_v28 = vpop.xlane.xlu2 %472  ;;  %562 = vadd.xlane.f32.xlu1 %v791_v26  ;;  %548 = vadd.xlane.f32.xlu0 %v789_v25 }
 0x1c2   :  { %v1080_v29 = vsub.f32 %v999_v42, %v485_v27  ;;  %v1084_v31 = vsub.f32 %v1003_v43, %v473_v28 }
 0x1c4   :  { %v532_v30 = vmul.f32 1.442695, %v1080_v29  ;;  %v793_v32 = vpop.eup %792  ;;  %v520_v33 = vmul.f32 1.442695, %v1084_v31 }
 0x1c6   :  { %794 = vpow2.f32 %v532_v30 }
 0x1c7   :  { %796 = vpow2.f32 %v520_v33 }
 0x1c9   :  { %v487_v34 = vpop.xlane.xlu2 %486  ;;  %550 = vadd.xlane.f32.xlu1 %v793_v32 }
 0x1ca   :  { %v1088_v35 = vsub.f32 %v1010_v47, %v487_v34 }
 0x1cc   :  { %v795_v36 = vpop.eup %794  ;;  %v534_v37 = vmul.f32 1.442695, %v1088_v35 }
 0x1cd   :  { %v489_v38 = vpop.xlane.xlu0 %488  ;;  %564 = vadd.xlane.f32.xlu2 %v795_v36  ;;  %v797_v43 = vpop.eup %796 }
 0x1ce   :  { %798 = vpow2.f32 %v534_v37  ;;  %v1092_v39 = vsub.f32 %v1017_v51, %v489_v38 }
 0x1d0   :  { %v536_v40 = vmul.f32 1.442695, %v1092_v39 }
 0x1d1   :  { %v475_v41 = vpop.xlane.xlu2 %474 }
 0x1d2   :  { %800 = vpow2.f32 %v536_v40  ;;  %v1096_v42 = vsub.f32 %v1023_v54, %v475_v41 }
 0x1d4   :  { %v799_v44 = vpop.eup %798  ;;  %v522_v45 = vmul.f32 1.442695, %v1096_v42 }
 0x1d5   :  { %552 = vadd.xlane.f32.xlu2 %v797_v43  ;;  %566 = vadd.xlane.f32.xlu0 %v799_v44  ;;  %v477_v46 = vpop.xlane.xlu0 %476 }
 0x1d6   :  { %802 = vpow2.f32 %v522_v45  ;;  %v1100_v47 = vsub.f32 %v1028_v56, %v477_v46 }
 0x1d8   :  { %v801_v48 = vpop.eup %800  ;;  %v524_v49 = vmul.f32 1.442695, %v1100_v47 }
 0x1d9   :  { %568 = vadd.xlane.f32.xlu1 %v801_v48  ;;  %v479_v50 = vpop.xlane.xlu1 %478 }
 0x1da   :  { %804 = vpow2.f32 %v524_v49  ;;  %v1104_v51 = vsub.f32 %v1034_v59, %v479_v50 }
 0x1dc   :  { %v803_v52 = vpop.eup %802  ;;  %v526_v53 = vmul.f32 1.442695, %v1104_v51 }
 0x1dd   :  { %v493_v54 = vpop.xlane.xlu2 %492  ;;  %554 = vadd.xlane.f32.xlu0 %v803_v52 }
 0x1de   :  { %806 = vpow2.f32 %v526_v53  ;;  %v1108_v55 = vsub.f32 %v1041_v63, %v493_v54 }
 0x1e0   :  { %v805_v56 = vpop.eup %804  ;;  %v540_v57 = vmul.f32 1.442695, %v1108_v55 }
 0x1e1   :  { %v491_v58 = vpop.xlane.xlu1 %490  ;;  %556 = vadd.xlane.f32.xlu1 %v805_v56 }
 0x1e2   :  { %808 = vpow2.f32 %v540_v57  ;;  %v1112_v60 = vsub.f32 %v1046_v0, %v491_v58 }
 0x1e4   :  { %v807_v59 = vpop.eup %806  ;;  %v538_v61 = vmul.f32 1.442695, %v1112_v60 }
 0x1e5   :  { %558 = vadd.xlane.f32.xlu2 %v807_v59  ;;  %v495_v62 = vpop.xlane.xlu0 %494 }
 0x1e6   :  { %810 = vpow2.f32 %v538_v61  ;;  %v1116_v1 = vsub.f32 %v1052_v3, %v495_v62 }
 0x1e8   :  { %v809_v63 = vpop.eup %808  ;;  %v542_v2 = vmul.f32 1.442695, %v1116_v1 }
 0x1e9   :  { %572 = vadd.xlane.f32.xlu0 %v809_v63 }
 0x1ea   :  { %812 = vpow2.f32 %v542_v2 }
 0x1ec   :  { %v811_v4 = vpop.eup %810 }
 0x1ed   :  { %570 = vadd.xlane.f32.xlu2 %v811_v4 }
 0x1f0   :  { %v813_v6 = vpop.eup %812 }
 0x1f1   :  { %574 = vadd.xlane.f32.xlu1 %v813_v6 }
 0x220   :  { %v545_v0 = vpop.xlane.xlu1 %544 }
 0x221   :  { %814 = vlog2.f32 %v545_v0 }
 0x227   :  { %v815_v7 = vpop.eup %814 }
 0x228   :  { %v577_v9 = vmul.f32 0.6931472, %v815_v7  ;;  %v547_v10 = vpop.xlane.xlu2 %546 }
 0x229   :  { %816 = vlog2.f32 %v547_v10 }
 0x22a   :  { %v608_v11 = vsub.f32 %v1056_v5, %v577_v9 }
 0x22c   :  { %624 = vst [vmem:[%s1188_s5] sm:$0xff] %v608_v11  ;;  %v561_v3 = vpop.xlane.xlu0 %560 }
 0x22d   :  { %818 = vlog2.f32 %v561_v3 }
 0x22f   :  { %v817_v13 = vpop.eup %816 }
 0x230   :  { %v579_v14 = vmul.f32 0.6931472, %v817_v13 }
 0x232   :  { %v609_v16 = vsub.f32 %v1060_v8, %v579_v14 }
 0x233   :  { %v819_v17 = vpop.eup %818 }
 0x234   :  { %625 = vst [vmem:[%s1188_s5 + $0x8] sm:$0xff] %v609_v16  ;;  %v593_v18 = vmul.f32 0.6931472, %v819_v17  ;;  %v563_v20 = vpop.xlane.xlu1 %562  ;;  %v549_v21 = vpop.xlane.xlu0 %548 }
 0x235   :  { %820 = vlog2.f32 %v563_v20 }
 0x236   :  { %v616_v5 = vsub.f32 %v1064_v12, %v593_v18  ;;  %822 = vlog2.f32 %v549_v21 }
 0x238   :  { %632 = vst [vmem:[%s1188_s5 + $0x40] sm:$0xff] %v616_v5 }
 0x23b   :  { %v821_v22 = vpop.eup %820 }
 0x23c   :  { %v823_v24 = vpop.eup %822  ;;  %v595_v25 = vmul.f32 0.6931472, %v821_v22  ;;  %v551_v8 = vpop.xlane.xlu1 %550 }
 0x23d   :  { %v581_v26 = vmul.f32 0.6931472, %v823_v24  ;;  %824 = vlog2.f32 %v551_v8 }
 0x23e   :  { %v617_v27 = vsub.f32 %v1072_v19, %v595_v25 }
 0x23f   :  { %v610_v28 = vsub.f32 %v1068_v15, %v581_v26 }
 0x240   :  { %633 = vst [vmem:[%s1188_s5 + $0x48] sm:$0xff] %v617_v27  ;;  %v565_v12 = vpop.xlane.xlu2 %564 }
 0x241   :  { %626 = vst [vmem:[%s1188_s5 + $0x10] sm:$0xff] %v610_v28  ;;  %826 = vlog2.f32 %v565_v12 }
 0x243   :  { %v825_v30 = vpop.eup %824 }
 0x244   :  { %v583_v32 = vmul.f32 0.6931472, %v825_v30 }
 0x246   :  { %v611_v33 = vsub.f32 %v1076_v23, %v583_v32 }
 0x247   :  { %v827_v34 = vpop.eup %826 }
 0x248   :  { %627 = vst [vmem:[%s1188_s5 + $0x18] sm:$0xff] %v611_v33  ;;  %v597_v15 = vmul.f32 0.6931472, %v827_v34  ;;  %v553_v19 = vpop.xlane.xlu2 %552  ;;  %v567_v36 = vpop.xlane.xlu0 %566 }
 0x249   :  { %828 = vlog2.f32 %v553_v19 }
 0x24a   :  { %v618_v37 = vsub.f32 %v1080_v29, %v597_v15  ;;  %830 = vlog2.f32 %v567_v36 }
 0x24c   :  { %634 = vst [vmem:[%s1188_s5 + $0x50] sm:$0xff] %v618_v37  ;;  %v569_v38 = vpop.xlane.xlu1 %568 }
 0x24d   :  { %832 = vlog2.f32 %v569_v38 }
 0x24f   :  { %v829_v40 = vpop.eup %828 }
 0x250   :  { %v831_v23 = vpop.eup %830  ;;  %v585_v41 = vmul.f32 0.6931472, %v829_v40  ;;  %v555_v43 = vpop.xlane.xlu0 %554 }
 0x251   :  { %v599_v44 = vmul.f32 0.6931472, %v831_v23  ;;  %834 = vlog2.f32 %v555_v43 }
 0x252   :  { %v612_v45 = vsub.f32 %v1084_v31, %v585_v41 }
 0x253   :  { %v833_v46 = vpop.eup %832  ;;  %v619_v48 = vsub.f32 %v1088_v35, %v599_v44 }
 0x254   :  { %628 = vst [vmem:[%s1188_s5 + $0x20] sm:$0xff] %v612_v45  ;;  %v601_v29 = vmul.f32 0.6931472, %v833_v46  ;;  %v557_v49 = vpop.xlane.xlu1 %556 }
 0x255   :  { %635 = vst [vmem:[%s1188_s5 + $0x58] sm:$0xff] %v619_v48  ;;  %836 = vlog2.f32 %v557_v49 }
 0x256   :  { %v620_v50 = vsub.f32 %v1092_v39, %v601_v29 }
 0x257   :  { %v835_v52 = vpop.eup %834 }
 0x258   :  { %636 = vst [vmem:[%s1188_s5 + $0x60] sm:$0xff] %v620_v50  ;;  %v587_v31 = vmul.f32 0.6931472, %v835_v52  ;;  %v559_v35 = vpop.xlane.xlu2 %558 }
 0x259   :  { %838 = vlog2.f32 %v559_v35 }
 0x25a   :  { %v613_v53 = vsub.f32 %v1096_v42, %v587_v31 }
 0x25b   :  { %v837_v54 = vpop.eup %836 }
 0x25c   :  { %629 = vst [vmem:[%s1188_s5 + $0x28] sm:$0xff] %v613_v53  ;;  %v589_v56 = vmul.f32 0.6931472, %v837_v54  ;;  %v573_v57 = vpop.xlane.xlu0 %572 }
 0x25d   :  { %840 = vlog2.f32 %v573_v57 }
 0x25e   :  { %v614_v39 = vsub.f32 %v1100_v47, %v589_v56 }
 0x25f   :  { %v839_v58 = vpop.eup %838 }
 0x260   :  { %630 = vst [vmem:[%s1188_s5 + $0x30] sm:$0xff] %v614_v39  ;;  %v591_v59 = vmul.f32 0.6931472, %v839_v58  ;;  %v571_v61 = vpop.xlane.xlu2 %570 }
 0x261   :  { %842 = vlog2.f32 %v571_v61 }
 0x262   :  { %v615_v42 = vsub.f32 %v1104_v51, %v591_v59 }
 0x263   :  { %v841_v62 = vpop.eup %840 }
 0x264   :  { %631 = vst [vmem:[%s1188_s5 + $0x38] sm:$0xff] %v615_v42  ;;  %v605_v63 = vmul.f32 0.6931472, %v841_v62  ;;  %v575_v2 = vpop.xlane.xlu1 %574 }
 0x265   :  { %844 = vlog2.f32 %v575_v2 }
 0x266   :  { %v622_v47 = vsub.f32 %v1108_v55, %v605_v63 }
 0x267   :  { %v843_v4 = vpop.eup %842 }
 0x268   :  { %638 = vst [vmem:[%s1188_s5 + $0x70] sm:$0xff] %v622_v47  ;;  %v603_v6 = vmul.f32 0.6931472, %v843_v4 }
 0x26a   :  { %v621_v0 = vsub.f32 %v1112_v60, %v603_v6 }
 0x26b   :  { %v845_v7 = vpop.eup %844 }
 0x26c   :  { %637 = vst [vmem:[%s1188_s5 + $0x68] sm:$0xff] %v621_v0  ;;  %v607_v51 = vmul.f32 0.6931472, %v845_v7 }
 0x26e   :  { %v623_v9 = vsub.f32 %v1116_v1, %v607_v51 }
 0x270   :  { %639 = vst [vmem:[%s1188_s5 + $0x78] sm:$0xff] %v623_v9 }

</bundles_post_ra>
